<compile_context>
chip_gen: v6e
topology: v6e:2x2x1
jax: 0.10.0
libtpu: 0.0.40
codegen_flags: <defaults>
</compile_context>

<pallas_src>
from functools import lru_cache
from typing import NamedTuple

import jax
import jax.numpy as jnp
from jax import lax
from jax.experimental import pallas as pl
from jax.experimental.pallas import tpu as pltpu


def _round_up(n, mult):
    return ((n + mult - 1) // mult) * mult


def _largest_divisor_leq(n, cap):
    for d in range(min(n, cap), 0, -1):
        if n % d == 0:
            return d
    return 1


# ---------------------------------------------------------------------------
# Pallas kernel: out[b,o,m] = sum_i x[b,i,m] * w[i,o,m]   (complex, real/imag stacked)
# ---------------------------------------------------------------------------
def _compl_mul2d_kernel(x_ref, w_ref, o_ref):
    # x_ref : (tB, 2, Cin_p, M_pad)    [:,0]=Re, [:,1]=Im   one batch tile
    # w_ref : (2, Cin_p, tCout, M_pad)                      one Cout tile of weights
    # o_ref : (tB, 2, tCout, M_pad)
    tb = x_ref.shape[0]
    cin_p = x_ref.shape[2]
    tcout, m_pad = o_ref.shape[2], o_ref.shape[3]
    assert cin_p % 8 == 0, "input channels must be zero-padded to a multiple of 8"

    # Sub-tile sizes: keep the two f32 accumulators (tco, tm) within a few vregs
    # (<= 8 x 512 x 4B x 2 = 32 KiB) so the Cin reduction never spills.
    tco = _largest_divisor_leq(tcout, 8)
    tm = 128 * _largest_divisor_leq(m_pad // 128, 4)
    n_co = tcout // tco
    n_m = m_pad // tm
    n_chunks = cin_p // 8

    for co in range(n_co):                                   # static, few iterations
        co0 = co * tco
        for mi in range(n_m):                                # static, few iterations
            m0 = mi * tm

            @pl.loop(0, tb)
            def _per_batch(b):
                def chunk_body(c, carry):
                    acc_r, acc_i = carry
                    ch0 = pl.multiple_of(c * 8, 8)           # aligned sublane chunk
                    xr_c = x_ref[b, 0, pl.ds(ch0, 8), pl.ds(m0, tm)]   # (8, tm)
                    xi_c = x_ref[b, 1, pl.ds(ch0, 8), pl.ds(m0, tm)]   # (8, tm)
                    for r in range(8):                       # partial (8-way) unroll
                        wr = w_ref[0, ch0 + r, pl.ds(co0, tco), pl.ds(m0, tm)]
                        wi = w_ref[1, ch0 + r, pl.ds(co0, tco), pl.ds(m0, tm)]
                        xr = xr_c[r:r + 1, :]                # (1, tm), bcast sublanes
                        xi = xi_c[r:r + 1, :]
                        acc_r = acc_r + (wr * xr - wi * xi)
                        acc_i = acc_i + (wr * xi + wi * xr)
                    return acc_r, acc_i

                zero = jnp.zeros((tco, tm), jnp.float32)
                acc_r, acc_i = lax.fori_loop(0, n_chunks, chunk_body, (zero, zero))
                o_ref[b, 0, pl.ds(co0, tco), pl.ds(m0, tm)] = acc_r
                o_ref[b, 1, pl.ds(co0, tco), pl.ds(m0, tm)] = acc_i


# ---------------------------------------------------------------------------
# Generation-aware tiling / VMEM budget
# ---------------------------------------------------------------------------
@lru_cache(maxsize=1)
def _generation_params():
    kind = ""
    try:
        kind = jax.devices()[0].device_kind.lower()
    except Exception:
        pass
    if "v7" in kind:
        # v7x: 64 MiB physical VMEM / core, 2 TensorCores / chip.
        return 36 * 2**20, 52 * 2**20, True
    if any(f"v{g}" in kind for g in (2, 3, 4, 5, 6)):
        # 128 MiB physical VMEM parts (v5e/v6e/...).
        return 72 * 2**20, 100 * 2**20, False
    # Unknown device -> conservative (v7x-like) numbers.
    return 36 * 2**20, 52 * 2**20, False


def _choose_tiles(B, Cin_p, Cout, M_pad, budget, prefer_cout_split):
    """Pick (tB, tCout) so the full double-buffered working set fits the budget."""
    def sub8(n):                                   # sublane-padded extent in VMEM
        return _round_up(n, 8)

    def working_set(tB, tCout):
        w = 2 * (2 * Cin_p * sub8(tCout) * M_pad * 4)        # weights (2 buffers)
        x = 2 * (tB * 2 * Cin_p * M_pad * 4)                 # x block  (2 buffers)
        o = 2 * (tB * 2 * sub8(tCout) * M_pad * 4)           # out block (2 buffers)
        return w + x + o

    cout_cands = sorted({Cout, *(t for t in range(8, Cout, 8) if Cout % t == 0)},
                        reverse=True)
    tb_cands = sorted({d for d in range(1, min(B, 8) + 1) if B % d == 0},
                      reverse=True)

    for tCout in cout_cands:                       # prefer fewer Cout tiles first
        for tB in tb_cands:                        # then the biggest batch tile
            if working_set(tB, tCout) <= budget:
                if prefer_cout_split and tCout == Cout and Cout % 16 == 0:
                    tCout = Cout // 2              # let megacore split the weights
                return tB, tCout
    # Nothing fits the soft budget: smallest tiles; vmem_limit_bytes may still cover
    # it (compile-time OOM risk only for extreme Cin * M_pad).
    return tb_cands[-1], cout_cands[-1]


def _compl_mul2d_pallas(x_stack, w_stack):
    """x_stack: (B, 2, Cin_p, M_pad) f32;  w_stack: (2, Cin_p, Cout, M_pad) f32.

    Returns out_stack: (B, 2, Cout, M_pad) f32.
    """
    B, _, Cin_p, M_pad = x_stack.shape
    Cout = w_stack.shape[2]
    budget, vmem_limit, prefer_split = _generation_params()
    tB, tCout = _choose_tiles(B, Cin_p, Cout, M_pad, budget, prefer_split)
    n_ct = Cout // tCout
    n_b = B // tB

    # Cout-tile axis outermost: each weight block is DMA'd once and stays resident
    # across the inner batch axis; x/out blocks are streamed per batch tile.
    x_spec = pl.BlockSpec((tB, 2, Cin_p, M_pad), lambda j, b: (b, 0, 0, 0))
    w_spec = pl.BlockSpec((2, Cin_p, tCout, M_pad), lambda j, b: (0, 0, j, 0))
    o_spec = pl.BlockSpec((tB, 2, tCout, M_pad), lambda j, b: (b, 0, j, 0))

    return pl.pallas_call(
        _compl_mul2d_kernel,
        out_shape=jax.ShapeDtypeStruct((B, 2, Cout, M_pad), jnp.float32),
        grid=(n_ct, n_b),
        in_specs=[x_spec, w_spec],
        out_specs=o_spec,
        compiler_params=pltpu.CompilerParams(
            dimension_semantics=("parallel", "parallel"),
            vmem_limit_bytes=int(vmem_limit),
        ),
    )(x_stack, w_stack)


# ---------------------------------------------------------------------------
# Weight preprocessing (hoisted — run once per parameter update, NOT per forward)
# ---------------------------------------------------------------------------
class SpectralPrep(NamedTuple):
    w: jax.Array        # (2, Cin_pad, Cout, M_pad) f32, [0]=Re, [1]=Im
    modes1: int
    modes2: int
    M: int
    M_pad: int
    Cin: int
    Cin_pad: int
    Cout: int


def prepare_spectral_weights(weights1, weights2):
    """weights1/weights2: (Cin, Cout, modes1, modes2) complex64."""
    assert weights1.shape == weights2.shape
    Cin, Cout, m1, m2 = weights1.shape
    M = 2 * m1 * m2
    M_pad = _round_up(M, 128)          # lane-dense, unmasked stores
    Cin_pad = _round_up(Cin, 8)        # aligned sublane chunks for the Cin loop

    w = jnp.concatenate([weights1, weights2], axis=2)        # (Cin, Cout, 2*m1, m2)
    wr = jnp.real(w).reshape(Cin, Cout, M).astype(jnp.float32)
    wi = jnp.imag(w).reshape(Cin, Cout, M).astype(jnp.float32)
    pad = ((0, Cin_pad - Cin), (0, 0), (0, M_pad - M))       # zero padding -> exact
    w_stack = jnp.stack([jnp.pad(wr, pad), jnp.pad(wi, pad)], axis=0)
    return SpectralPrep(w=w_stack, modes1=m1, modes2=m2, M=M, M_pad=M_pad,
                        Cin=Cin, Cin_pad=Cin_pad, Cout=Cout)


# ---------------------------------------------------------------------------
# Full forward pass of SpectralConv2d_fast
# ---------------------------------------------------------------------------
def spectral_conv2d_fast_prepared(x, prep: SpectralPrep):
    """x: [B, Cin, H, W] float32 (NCHW).  Returns [B, Cout, H, W]."""
    B, Cin, H, W = x.shape
    assert Cin == prep.Cin
    m1, m2 = prep.modes1, prep.modes2
    Wf = W // 2 + 1
    assert 2 * m1 <= H and m2 <= Wf, "retained modes must fit the FFT grid"

    # TODO(synk): rfft2 / irfft2 have no Pallas TPU equivalent; kept in plain JAX.
    x_ft = jnp.fft.rfft2(x)                                  # (B, Cin, H, Wf) c64

    # Fuse low- and high-frequency mode blocks along one flattened mode axis.
    x_modes = jnp.concatenate(
        [x_ft[:, :, :m1, :m2], x_ft[:, :, H - m1:, :m2]], axis=2)   # (B,Cin,2*m1,m2)
    xr = jnp.real(x_modes).reshape(B, Cin, prep.M).astype(jnp.float32)
    xi = jnp.imag(x_modes).reshape(B, Cin, prep.M).astype(jnp.float32)
    pad = ((0, 0), (0, prep.Cin_pad - Cin), (0, prep.M_pad - prep.M))
    x_stack = jnp.stack([jnp.pad(xr, pad), jnp.pad(xi, pad)], axis=1)

    out_stack = _compl_mul2d_pallas(x_stack, prep.w)         # (B, 2, Cout, M_pad)

    Cout = prep.Cout
    out_modes = (out_stack[:, 0, :, :prep.M]
                 + 1j * out_stack[:, 1, :, :prep.M]).astype(jnp.complex64)
    out_modes = out_modes.reshape(B, Cout, 2 * m1, m2)

    # Assemble out_ft with concat + pad (no full zero-init + scatter updates).
    lo, hi = out_modes[:, :, :m1], out_modes[:, :, m1:]
    mid = jnp.zeros((B, Cout, H - 2 * m1, m2), jnp.complex64)
    out_ft = jnp.concatenate([lo, mid, hi], axis=2)          # (B, Cout, H, m2)
    out_ft = jnp.pad(out_ft, ((0, 0), (0, 0), (0, 0), (0, Wf - m2)))

    return jnp.fft.irfft2(out_ft, s=(H, W)).astype(x.dtype)


def spectral_conv2d_fast(x, weights1, weights2, modes1, modes2):
    """Convenience wrapper with the original module signature.

    For repeated forwards, hoist prepare_spectral_weights() out of the loop and
    call spectral_conv2d_fast_prepared() instead.
    """
    prep = prepare_spectral_weights(weights1, weights2)
    assert (prep.modes1, prep.modes2) == (modes1, modes2)
    return spectral_conv2d_fast_prepared(x, prep)


# ---------------------------------------------------------------------------
# Pure-JAX reference (mirrors the PyTorch module exactly)
# ---------------------------------------------------------------------------
def _reference(x, w1, w2, m1, m2):
    B, Cin, H, W = x.shape
    Cout = w1.shape[1]
    x_ft = jnp.fft.rfft2(x)
    out_ft = jnp.zeros((B, Cout, H, W // 2 + 1), jnp.complex64)
    out_ft = out_ft.at[:, :, :m1, :m2].set(
        jnp.einsum("bixy,ioxy->boxy", x_ft[:, :, :m1, :m2], w1))
    out_ft = out_ft.at[:, :, H - m1:, :m2].set(
        jnp.einsum("bixy,ioxy->boxy", x_ft[:, :, H - m1:, :m2], w2))
    return jnp.fft.irfft2(out_ft, s=(H, W))


if __name__ == "__main__":
    # Small, module-consistent shapes.
    B, Cin, Cout = 2, 4, 4
    H = W = 16
    modes1 = modes2 = 4

    key = jax.random.PRNGKey(0)
    k1r, k1i, k2r, k2i, kx = jax.random.split(key, 5)

    scale = 1.0 / (Cin * Cout)
    weights1 = (scale * (
        jax.random.uniform(k1r, (Cin, Cout, modes1, modes2), dtype=jnp.float32)
        + 1j * jax.random.uniform(k1i, (Cin, Cout, modes1, modes2), dtype=jnp.float32)
    )).astype(jnp.complex64)
    weights2 = (scale * (
        jax.random.uniform(k2r, (Cin, Cout, modes1, modes2), dtype=jnp.float32)
        + 1j * jax.random.uniform(k2i, (Cin, Cout, modes1, modes2), dtype=jnp.float32)
    )).astype(jnp.complex64)

    x = jax.random.normal(kx, (B, Cin, H, W), dtype=jnp.float32)

    # Weight prep is hoisted: done once, reused across forwards.
    prep = prepare_spectral_weights(weights1, weights2)

    out = spectral_conv2d_fast_prepared(x, prep)
    out = jax.block_until_ready(out)

    ref = _reference(x, weights1, weights2, modes1, modes2)
    assert out.shape == (B, Cout, H, W)
    assert jnp.allclose(out, ref, atol=1e-4, rtol=1e-4)

    print("KERNEL_OK")
</pallas_src>

<mosaic_0001>
module attributes {stable_mosaic.version = 11 : i64} {
  func.func @_compl_mul2d_kernel(%arg0: i32, %arg1: i32, %arg2: memref<2x2x8x128xf32, #tpu.memory_space<vmem>>, %arg3: memref<2x8x4x128xf32, #tpu.memory_space<vmem>>, %arg4: memref<2x2x4x128xf32, #tpu.memory_space<vmem>>) attributes {dimension_semantics = [#tpu.dimension_semantics<parallel>, #tpu.dimension_semantics<parallel>], iteration_bounds = array<i64: 1, 1>, scalar_prefetch = 0 : i64, scratch_operands = 0 : i64, tpu.core_type = #tpu.core_type<tc>, window_params = [{transform_indices = @transform_0, window_bounds = array<i64: 2, 2, 8, 128>}, {transform_indices = @transform_1, window_bounds = array<i64: 2, 8, 4, 128>}, {transform_indices = @transform_2, window_bounds = array<i64: 2, 2, 4, 128>}]} {
    %c0_i32 = arith.constant 0 : i32
    %c2_i32 = arith.constant 2 : i32
    %0 = arith.addi %c0_i32, %c2_i32 : i32
    %c1_i32 = arith.constant 1 : i32
    scf.for %arg5 = %c0_i32 to %0 step %c1_i32  : i32 {
      %c1_i32_1 = arith.constant 1 : i32
      %1 = arith.muli %arg5, %c1_i32_1 : i32
      %c0_i32_2 = arith.constant 0 : i32
      %2 = arith.addi %c0_i32_2, %1 : i32
      %cst = arith.constant 0.000000e+00 : f32
      %3 = vector.broadcast %cst : f32 to vector<4x128xf32>
      %c0_i32_3 = arith.constant 0 : i32
      %c8_i32 = arith.constant 8 : i32
      %4 = arith.muli %c0_i32_3, %c8_i32 : i32
      %5 = tpu.assume_multiple %4, 8 : i32
      %6 = arith.index_cast %2 : i32 to index
      %c0 = arith.constant 0 : index
      %7 = arith.index_cast %5 : i32 to index
      %c0_4 = arith.constant 0 : index
      %8 = vector.load %arg2[%6, %c0, %7, %c0_4] : memref<2x2x8x128xf32, #tpu.memory_space<vmem>>, vector<1x1x8x128xf32>
      %9 = vector.shape_cast %8 : vector<1x1x8x128xf32> to vector<8x128xf32>
      %10 = arith.index_cast %2 : i32 to index
      %c1 = arith.constant 1 : index
      %11 = arith.index_cast %5 : i32 to index
      %c0_5 = arith.constant 0 : index
      %12 = vector.load %arg2[%10, %c1, %11, %c0_5] : memref<2x2x8x128xf32, #tpu.memory_space<vmem>>, vector<1x1x8x128xf32>
      %13 = vector.shape_cast %12 : vector<1x1x8x128xf32> to vector<8x128xf32>
      %c0_i32_6 = arith.constant 0 : i32
      %14 = arith.addi %5, %c0_i32_6 : i32
      %c0_7 = arith.constant 0 : index
      %15 = arith.index_cast %14 : i32 to index
      %c0_8 = arith.constant 0 : index
      %c0_9 = arith.constant 0 : index
      %16 = vector.load %arg3[%c0_7, %15, %c0_8, %c0_9] : memref<2x8x4x128xf32, #tpu.memory_space<vmem>>, vector<1x1x4x128xf32>
      %17 = vector.shape_cast %16 : vector<1x1x4x128xf32> to vector<4x128xf32>
      %c0_i32_10 = arith.constant 0 : i32
      %18 = arith.addi %5, %c0_i32_10 : i32
      %c1_11 = arith.constant 1 : index
      %19 = arith.index_cast %18 : i32 to index
      %c0_12 = arith.constant 0 : index
      %c0_13 = arith.constant 0 : index
      %20 = vector.load %arg3[%c1_11, %19, %c0_12, %c0_13] : memref<2x8x4x128xf32, #tpu.memory_space<vmem>>, vector<1x1x4x128xf32>
      %21 = vector.shape_cast %20 : vector<1x1x4x128xf32> to vector<4x128xf32>
      %22 = vector.extract_strided_slice %9 {offsets = [0, 0], sizes = [1, 128], strides = [1, 1]} : vector<8x128xf32> to vector<1x128xf32>
      %23 = vector.extract_strided_slice %13 {offsets = [0, 0], sizes = [1, 128], strides = [1, 1]} : vector<8x128xf32> to vector<1x128xf32>
      %24 = vector.broadcast %22 : vector<1x128xf32> to vector<4x128xf32>
      %25 = arith.mulf %17, %24 : vector<4x128xf32>
      %26 = vector.broadcast %23 : vector<1x128xf32> to vector<4x128xf32>
      %27 = arith.mulf %21, %26 : vector<4x128xf32>
      %28 = arith.subf %25, %27 : vector<4x128xf32>
      %29 = arith.addf %3, %28 : vector<4x128xf32>
      %30 = vector.broadcast %23 : vector<1x128xf32> to vector<4x128xf32>
      %31 = arith.mulf %17, %30 : vector<4x128xf32>
      %32 = vector.broadcast %22 : vector<1x128xf32> to vector<4x128xf32>
      %33 = arith.mulf %21, %32 : vector<4x128xf32>
      %34 = arith.addf %31, %33 : vector<4x128xf32>
      %35 = arith.addf %3, %34 : vector<4x128xf32>
      %c1_i32_14 = arith.constant 1 : i32
      %36 = arith.addi %5, %c1_i32_14 : i32
      %c0_15 = arith.constant 0 : index
      %37 = arith.index_cast %36 : i32 to index
      %c0_16 = arith.constant 0 : index
      %c0_17 = arith.constant 0 : index
      %38 = vector.load %arg3[%c0_15, %37, %c0_16, %c0_17] : memref<2x8x4x128xf32, #tpu.memory_space<vmem>>, vector<1x1x4x128xf32>
      %39 = vector.shape_cast %38 : vector<1x1x4x128xf32> to vector<4x128xf32>
      %c1_i32_18 = arith.constant 1 : i32
      %40 = arith.addi %5, %c1_i32_18 : i32
      %c1_19 = arith.constant 1 : index
      %41 = arith.index_cast %40 : i32 to index
      %c0_20 = arith.constant 0 : index
      %c0_21 = arith.constant 0 : index
      %42 = vector.load %arg3[%c1_19, %41, %c0_20, %c0_21] : memref<2x8x4x128xf32, #tpu.memory_space<vmem>>, vector<1x1x4x128xf32>
      %43 = vector.shape_cast %42 : vector<1x1x4x128xf32> to vector<4x128xf32>
      %44 = vector.extract_strided_slice %9 {offsets = [1, 0], sizes = [1, 128], strides = [1, 1]} : vector<8x128xf32> to vector<1x128xf32>
      %45 = vector.extract_strided_slice %13 {offsets = [1, 0], sizes = [1, 128], strides = [1, 1]} : vector<8x128xf32> to vector<1x128xf32>
      %46 = vector.broadcast %44 : vector<1x128xf32> to vector<4x128xf32>
      %47 = arith.mulf %39, %46 : vector<4x128xf32>
      %48 = vector.broadcast %45 : vector<1x128xf32> to vector<4x128xf32>
      %49 = arith.mulf %43, %48 : vector<4x128xf32>
      %50 = arith.subf %47, %49 : vector<4x128xf32>
      %51 = arith.addf %29, %50 : vector<4x128xf32>
      %52 = vector.broadcast %45 : vector<1x128xf32> to vector<4x128xf32>
      %53 = arith.mulf %39, %52 : vector<4x128xf32>
      %54 = vector.broadcast %44 : vector<1x128xf32> to vector<4x128xf32>
      %55 = arith.mulf %43, %54 : vector<4x128xf32>
      %56 = arith.addf %53, %55 : vector<4x128xf32>
      %57 = arith.addf %35, %56 : vector<4x128xf32>
      %c2_i32_22 = arith.constant 2 : i32
      %58 = arith.addi %5, %c2_i32_22 : i32
      %c0_23 = arith.constant 0 : index
      %59 = arith.index_cast %58 : i32 to index
      %c0_24 = arith.constant 0 : index
      %c0_25 = arith.constant 0 : index
      %60 = vector.load %arg3[%c0_23, %59, %c0_24, %c0_25] : memref<2x8x4x128xf32, #tpu.memory_space<vmem>>, vector<1x1x4x128xf32>
      %61 = vector.shape_cast %60 : vector<1x1x4x128xf32> to vector<4x128xf32>
      %c2_i32_26 = arith.constant 2 : i32
      %62 = arith.addi %5, %c2_i32_26 : i32
      %c1_27 = arith.constant 1 : index
      %63 = arith.index_cast %62 : i32 to index
      %c0_28 = arith.constant 0 : index
      %c0_29 = arith.constant 0 : index
      %64 = vector.load %arg3[%c1_27, %63, %c0_28, %c0_29] : memref<2x8x4x128xf32, #tpu.memory_space<vmem>>, vector<1x1x4x128xf32>
      %65 = vector.shape_cast %64 : vector<1x1x4x128xf32> to vector<4x128xf32>
      %66 = vector.extract_strided_slice %9 {offsets = [2, 0], sizes = [1, 128], strides = [1, 1]} : vector<8x128xf32> to vector<1x128xf32>
      %67 = vector.extract_strided_slice %13 {offsets = [2, 0], sizes = [1, 128], strides = [1, 1]} : vector<8x128xf32> to vector<1x128xf32>
      %68 = vector.broadcast %66 : vector<1x128xf32> to vector<4x128xf32>
      %69 = arith.mulf %61, %68 : vector<4x128xf32>
      %70 = vector.broadcast %67 : vector<1x128xf32> to vector<4x128xf32>
      %71 = arith.mulf %65, %70 : vector<4x128xf32>
      %72 = arith.subf %69, %71 : vector<4x128xf32>
      %73 = arith.addf %51, %72 : vector<4x128xf32>
      %74 = vector.broadcast %67 : vector<1x128xf32> to vector<4x128xf32>
      %75 = arith.mulf %61, %74 : vector<4x128xf32>
      %76 = vector.broadcast %66 : vector<1x128xf32> to vector<4x128xf32>
      %77 = arith.mulf %65, %76 : vector<4x128xf32>
      %78 = arith.addf %75, %77 : vector<4x128xf32>
      %79 = arith.addf %57, %78 : vector<4x128xf32>
      %c3_i32 = arith.constant 3 : i32
      %80 = arith.addi %5, %c3_i32 : i32
      %c0_30 = arith.constant 0 : index
      %81 = arith.index_cast %80 : i32 to index
      %c0_31 = arith.constant 0 : index
      %c0_32 = arith.constant 0 : index
      %82 = vector.load %arg3[%c0_30, %81, %c0_31, %c0_32] : memref<2x8x4x128xf32, #tpu.memory_space<vmem>>, vector<1x1x4x128xf32>
      %83 = vector.shape_cast %82 : vector<1x1x4x128xf32> to vector<4x128xf32>
      %c3_i32_33 = arith.constant 3 : i32
      %84 = arith.addi %5, %c3_i32_33 : i32
      %c1_34 = arith.constant 1 : index
      %85 = arith.index_cast %84 : i32 to index
      %c0_35 = arith.constant 0 : index
      %c0_36 = arith.constant 0 : index
      %86 = vector.load %arg3[%c1_34, %85, %c0_35, %c0_36] : memref<2x8x4x128xf32, #tpu.memory_space<vmem>>, vector<1x1x4x128xf32>
      %87 = vector.shape_cast %86 : vector<1x1x4x128xf32> to vector<4x128xf32>
      %88 = vector.extract_strided_slice %9 {offsets = [3, 0], sizes = [1, 128], strides = [1, 1]} : vector<8x128xf32> to vector<1x128xf32>
      %89 = vector.extract_strided_slice %13 {offsets = [3, 0], sizes = [1, 128], strides = [1, 1]} : vector<8x128xf32> to vector<1x128xf32>
      %90 = vector.broadcast %88 : vector<1x128xf32> to vector<4x128xf32>
      %91 = arith.mulf %83, %90 : vector<4x128xf32>
      %92 = vector.broadcast %89 : vector<1x128xf32> to vector<4x128xf32>
      %93 = arith.mulf %87, %92 : vector<4x128xf32>
      %94 = arith.subf %91, %93 : vector<4x128xf32>
      %95 = arith.addf %73, %94 : vector<4x128xf32>
      %96 = vector.broadcast %89 : vector<1x128xf32> to vector<4x128xf32>
      %97 = arith.mulf %83, %96 : vector<4x128xf32>
      %98 = vector.broadcast %88 : vector<1x128xf32> to vector<4x128xf32>
      %99 = arith.mulf %87, %98 : vector<4x128xf32>
      %100 = arith.addf %97, %99 : vector<4x128xf32>
      %101 = arith.addf %79, %100 : vector<4x128xf32>
      %c4_i32 = arith.constant 4 : i32
      %102 = arith.addi %5, %c4_i32 : i32
      %c0_37 = arith.constant 0 : index
      %103 = arith.index_cast %102 : i32 to index
      %c0_38 = arith.constant 0 : index
      %c0_39 = arith.constant 0 : index
      %104 = vector.load %arg3[%c0_37, %103, %c0_38, %c0_39] : memref<2x8x4x128xf32, #tpu.memory_space<vmem>>, vector<1x1x4x128xf32>
      %105 = vector.shape_cast %104 : vector<1x1x4x128xf32> to vector<4x128xf32>
      %c4_i32_40 = arith.constant 4 : i32
      %106 = arith.addi %5, %c4_i32_40 : i32
      %c1_41 = arith.constant 1 : index
      %107 = arith.index_cast %106 : i32 to index
      %c0_42 = arith.constant 0 : index
      %c0_43 = arith.constant 0 : index
      %108 = vector.load %arg3[%c1_41, %107, %c0_42, %c0_43] : memref<2x8x4x128xf32, #tpu.memory_space<vmem>>, vector<1x1x4x128xf32>
      %109 = vector.shape_cast %108 : vector<1x1x4x128xf32> to vector<4x128xf32>
      %110 = vector.extract_strided_slice %9 {offsets = [4, 0], sizes = [1, 128], strides = [1, 1]} : vector<8x128xf32> to vector<1x128xf32>
      %111 = vector.extract_strided_slice %13 {offsets = [4, 0], sizes = [1, 128], strides = [1, 1]} : vector<8x128xf32> to vector<1x128xf32>
      %112 = vector.broadcast %110 : vector<1x128xf32> to vector<4x128xf32>
      %113 = arith.mulf %105, %112 : vector<4x128xf32>
      %114 = vector.broadcast %111 : vector<1x128xf32> to vector<4x128xf32>
      %115 = arith.mulf %109, %114 : vector<4x128xf32>
      %116 = arith.subf %113, %115 : vector<4x128xf32>
      %117 = arith.addf %95, %116 : vector<4x128xf32>
      %118 = vector.broadcast %111 : vector<1x128xf32> to vector<4x128xf32>
      %119 = arith.mulf %105, %118 : vector<4x128xf32>
      %120 = vector.broadcast %110 : vector<1x128xf32> to vector<4x128xf32>
      %121 = arith.mulf %109, %120 : vector<4x128xf32>
      %122 = arith.addf %119, %121 : vector<4x128xf32>
      %123 = arith.addf %101, %122 : vector<4x128xf32>
      %c5_i32 = arith.constant 5 : i32
      %124 = arith.addi %5, %c5_i32 : i32
      %c0_44 = arith.constant 0 : index
      %125 = arith.index_cast %124 : i32 to index
      %c0_45 = arith.constant 0 : index
      %c0_46 = arith.constant 0 : index
      %126 = vector.load %arg3[%c0_44, %125, %c0_45, %c0_46] : memref<2x8x4x128xf32, #tpu.memory_space<vmem>>, vector<1x1x4x128xf32>
      %127 = vector.shape_cast %126 : vector<1x1x4x128xf32> to vector<4x128xf32>
      %c5_i32_47 = arith.constant 5 : i32
      %128 = arith.addi %5, %c5_i32_47 : i32
      %c1_48 = arith.constant 1 : index
      %129 = arith.index_cast %128 : i32 to index
      %c0_49 = arith.constant 0 : index
      %c0_50 = arith.constant 0 : index
      %130 = vector.load %arg3[%c1_48, %129, %c0_49, %c0_50] : memref<2x8x4x128xf32, #tpu.memory_space<vmem>>, vector<1x1x4x128xf32>
      %131 = vector.shape_cast %130 : vector<1x1x4x128xf32> to vector<4x128xf32>
      %132 = vector.extract_strided_slice %9 {offsets = [5, 0], sizes = [1, 128], strides = [1, 1]} : vector<8x128xf32> to vector<1x128xf32>
      %133 = vector.extract_strided_slice %13 {offsets = [5, 0], sizes = [1, 128], strides = [1, 1]} : vector<8x128xf32> to vector<1x128xf32>
      %134 = vector.broadcast %132 : vector<1x128xf32> to vector<4x128xf32>
      %135 = arith.mulf %127, %134 : vector<4x128xf32>
      %136 = vector.broadcast %133 : vector<1x128xf32> to vector<4x128xf32>
      %137 = arith.mulf %131, %136 : vector<4x128xf32>
      %138 = arith.subf %135, %137 : vector<4x128xf32>
      %139 = arith.addf %117, %138 : vector<4x128xf32>
      %140 = vector.broadcast %133 : vector<1x128xf32> to vector<4x128xf32>
      %141 = arith.mulf %127, %140 : vector<4x128xf32>
      %142 = vector.broadcast %132 : vector<1x128xf32> to vector<4x128xf32>
      %143 = arith.mulf %131, %142 : vector<4x128xf32>
      %144 = arith.addf %141, %143 : vector<4x128xf32>
      %145 = arith.addf %123, %144 : vector<4x128xf32>
      %c6_i32 = arith.constant 6 : i32
      %146 = arith.addi %5, %c6_i32 : i32
      %c0_51 = arith.constant 0 : index
      %147 = arith.index_cast %146 : i32 to index
      %c0_52 = arith.constant 0 : index
      %c0_53 = arith.constant 0 : index
      %148 = vector.load %arg3[%c0_51, %147, %c0_52, %c0_53] : memref<2x8x4x128xf32, #tpu.memory_space<vmem>>, vector<1x1x4x128xf32>
      %149 = vector.shape_cast %148 : vector<1x1x4x128xf32> to vector<4x128xf32>
      %c6_i32_54 = arith.constant 6 : i32
      %150 = arith.addi %5, %c6_i32_54 : i32
      %c1_55 = arith.constant 1 : index
      %151 = arith.index_cast %150 : i32 to index
      %c0_56 = arith.constant 0 : index
      %c0_57 = arith.constant 0 : index
      %152 = vector.load %arg3[%c1_55, %151, %c0_56, %c0_57] : memref<2x8x4x128xf32, #tpu.memory_space<vmem>>, vector<1x1x4x128xf32>
      %153 = vector.shape_cast %152 : vector<1x1x4x128xf32> to vector<4x128xf32>
      %154 = vector.extract_strided_slice %9 {offsets = [6, 0], sizes = [1, 128], strides = [1, 1]} : vector<8x128xf32> to vector<1x128xf32>
      %155 = vector.extract_strided_slice %13 {offsets = [6, 0], sizes = [1, 128], strides = [1, 1]} : vector<8x128xf32> to vector<1x128xf32>
      %156 = vector.broadcast %154 : vector<1x128xf32> to vector<4x128xf32>
      %157 = arith.mulf %149, %156 : vector<4x128xf32>
      %158 = vector.broadcast %155 : vector<1x128xf32> to vector<4x128xf32>
      %159 = arith.mulf %153, %158 : vector<4x128xf32>
      %160 = arith.subf %157, %159 : vector<4x128xf32>
      %161 = arith.addf %139, %160 : vector<4x128xf32>
      %162 = vector.broadcast %155 : vector<1x128xf32> to vector<4x128xf32>
      %163 = arith.mulf %149, %162 : vector<4x128xf32>
      %164 = vector.broadcast %154 : vector<1x128xf32> to vector<4x128xf32>
      %165 = arith.mulf %153, %164 : vector<4x128xf32>
      %166 = arith.addf %163, %165 : vector<4x128xf32>
      %167 = arith.addf %145, %166 : vector<4x128xf32>
      %c7_i32 = arith.constant 7 : i32
      %168 = arith.addi %5, %c7_i32 : i32
      %c0_58 = arith.constant 0 : index
      %169 = arith.index_cast %168 : i32 to index
      %c0_59 = arith.constant 0 : index
      %c0_60 = arith.constant 0 : index
      %170 = vector.load %arg3[%c0_58, %169, %c0_59, %c0_60] : memref<2x8x4x128xf32, #tpu.memory_space<vmem>>, vector<1x1x4x128xf32>
      %171 = vector.shape_cast %170 : vector<1x1x4x128xf32> to vector<4x128xf32>
      %c7_i32_61 = arith.constant 7 : i32
      %172 = arith.addi %5, %c7_i32_61 : i32
      %c1_62 = arith.constant 1 : index
      %173 = arith.index_cast %172 : i32 to index
      %c0_63 = arith.constant 0 : index
      %c0_64 = arith.constant 0 : index
      %174 = vector.load %arg3[%c1_62, %173, %c0_63, %c0_64] : memref<2x8x4x128xf32, #tpu.memory_space<vmem>>, vector<1x1x4x128xf32>
      %175 = vector.shape_cast %174 : vector<1x1x4x128xf32> to vector<4x128xf32>
      %176 = vector.extract_strided_slice %9 {offsets = [7, 0], sizes = [1, 128], strides = [1, 1]} : vector<8x128xf32> to vector<1x128xf32>
      %177 = vector.extract_strided_slice %13 {offsets = [7, 0], sizes = [1, 128], strides = [1, 1]} : vector<8x128xf32> to vector<1x128xf32>
      %178 = vector.broadcast %176 : vector<1x128xf32> to vector<4x128xf32>
      %179 = arith.mulf %171, %178 : vector<4x128xf32>
      %180 = vector.broadcast %177 : vector<1x128xf32> to vector<4x128xf32>
      %181 = arith.mulf %175, %180 : vector<4x128xf32>
      %182 = arith.subf %179, %181 : vector<4x128xf32>
      %183 = arith.addf %161, %182 : vector<4x128xf32>
      %184 = vector.broadcast %177 : vector<1x128xf32> to vector<4x128xf32>
      %185 = arith.mulf %171, %184 : vector<4x128xf32>
      %186 = vector.broadcast %176 : vector<1x128xf32> to vector<4x128xf32>
      %187 = arith.mulf %175, %186 : vector<4x128xf32>
      %188 = arith.addf %185, %187 : vector<4x128xf32>
      %189 = arith.addf %167, %188 : vector<4x128xf32>
      %c1_i32_65 = arith.constant 1 : i32
      %190 = arith.index_cast %2 : i32 to index
      %c0_66 = arith.constant 0 : index
      %c0_67 = arith.constant 0 : index
      %c0_68 = arith.constant 0 : index
      %191 = vector.load %arg4[%190, %c0_66, %c0_67, %c0_68] : memref<2x2x4x128xf32, #tpu.memory_space<vmem>>, vector<1x1x4x128xf32>
      %192 = vector.shape_cast %191 : vector<1x1x4x128xf32> to vector<4x128xf32>
      %193 = vector.shape_cast %183 : vector<4x128xf32> to vector<1x1x4x128xf32>
      tpu.vector_store %arg4[%190, %c0_66, %c0_67, %c0_68], %193 {strides = array<i32>} : memref<2x2x4x128xf32, #tpu.memory_space<vmem>>, vector<1x1x4x128xf32>,
      %194 = arith.index_cast %2 : i32 to index
      %c1_69 = arith.constant 1 : index
      %c0_70 = arith.constant 0 : index
      %c0_71 = arith.constant 0 : index
      %195 = vector.load %arg4[%194, %c1_69, %c0_70, %c0_71] : memref<2x2x4x128xf32, #tpu.memory_space<vmem>>, vector<1x1x4x128xf32>
      %196 = vector.shape_cast %195 : vector<1x1x4x128xf32> to vector<4x128xf32>
      %197 = vector.shape_cast %189 : vector<4x128xf32> to vector<1x1x4x128xf32>
      tpu.vector_store %arg4[%194, %c1_69, %c0_70, %c0_71], %197 {strides = array<i32>} : memref<2x2x4x128xf32, #tpu.memory_space<vmem>>, vector<1x1x4x128xf32>,
    }
    %c2_i32_0 = arith.constant 2 : i32
    return
  }
  func.func @transform_0(%arg0: i32, %arg1: i32) -> (i32, i32, i32, i32) {
    %c0_i32 = arith.constant 0 : i32
    %c0_i32_0 = arith.constant 0 : i32
    %c0_i32_1 = arith.constant 0 : i32
    %c0_i32_2 = arith.constant 0 : i32
    return %arg1, %c0_i32, %c0_i32_0, %c0_i32_1 : i32, i32, i32, i32
  }
  func.func @transform_1(%arg0: i32, %arg1: i32) -> (i32, i32, i32, i32) {
    %c0_i32 = arith.constant 0 : i32
    %c0_i32_0 = arith.constant 0 : i32
    %c0_i32_1 = arith.constant 0 : i32
    %c0_i32_2 = arith.constant 0 : i32
    return %c0_i32, %c0_i32_0, %arg0, %c0_i32_1 : i32, i32, i32, i32
  }
  func.func @transform_2(%arg0: i32, %arg1: i32) -> (i32, i32, i32, i32) {
    %c0_i32 = arith.constant 0 : i32
    %c0_i32_0 = arith.constant 0 : i32
    %c0_i32_1 = arith.constant 0 : i32
    return %arg1, %c0_i32, %arg0, %c0_i32_0 : i32, i32, i32, i32
  }
}

</mosaic_0001>

<bundles_post_ra>
// kernel: tpu_custom_call.1
= control target key start
LH: loop header
LB: loop body
LE: loop exit
PB: predicated region body
PF: predicated region fallthrough
CT: control target
= control target key end

     0   :  { %7 = vsyncpa [#allocation3], 0  ;;  %s455_s0 = inlined_call_operand.hbm [shape: f32[2,2,8,128], index: 0, kind: input, shape index: {}]   ;;  %s456_s1 = inlined_call_operand.hbm [shape: f32[2,8,4,128], index: 1, kind: input, shape index: {}]   ;;  %s457_s2 = inlined_call_operand.hbm [shape: f32[2,2,4,128], index: 2, kind: output, shape index: {}]  }
   0x1   :  { %8 = vsyncpa [#allocation6], 0 }
   0x2   :  { %9 = vsyncpa [#allocation4], 0  ;;  %s386_s9 = smov [#allocation2]  }
   0x3   :  { %s15_s10 = sshll.u32 %s386_s9, 4  ;;  %s16_s10 = int_to_ptr.vmem [resolvable:$true] %s15_s10 }
   0x4   :  { %s320_s11 = scalar_lea.vmem %s16_s10, 512  ;;  %p325_p1 = scmp.lt.s32.totalorder %s16_s10, %s16_s10 }
   0x5   :  { %p321_p0 = scmp.ne.s32.totalorder %s16_s10, %s320_s11  ;;  %p326_p2 = scmp.lt.s32.totalorder %s320_s11, %s320_s11 }
   0x7   :  { %p327_p3 = por %p326_p2, %p325_p1 }
   0x9   :  { %p328_p4 = pnand %p327_p3, %p321_p0 }
   0xb   :  { %331 = shalt.err (!%p328_p4)
}
   0xc   :  { %s387_s12 = smov 128   ;;  %s388_s13 = smov 8  }
   0xd   :  { %21 = dma.hbm_to_vmem [thread:$0]  %s455_s0, 512, %s16_s10, [#allocation3], %s387_s12, %s387_s12, %s388_s13  }
   0xe   :  { %s389_s16 = smov [#allocation5]  }
   0xf   :  { %s27_s17 = sshll.u32 %s389_s16, 4  ;;  %s28_s17 = int_to_ptr.vmem [resolvable:$true] %s27_s17 }
  0x10   :  { %s340_s18 = scalar_lea.vmem %s28_s17, 1024  ;;  %p345_p6 = scmp.lt.s32.totalorder %s28_s17, %s28_s17 }
  0x11   :  { %p341_p5 = scmp.ne.s32.totalorder %s28_s17, %s340_s18  ;;  %p346_p7 = scmp.lt.s32.totalorder %s340_s18, %s340_s18 }
  0x13   :  { %p347_p8 = por %p346_p7, %p345_p6 }
  0x15   :  { %p348_p9 = pnand %p347_p8, %p341_p5 }
  0x17   :  { %351 = shalt.err (!%p348_p9)
}
  0x18   :  { %s390_s19 = smov 64   ;;  %s391_s20 = smov 4  }
  0x19   :  { %33 = dma.hbm_to_vmem [thread:$0]  %s456_s1, 1024, %s28_s17, [#allocation6], %s390_s19, %s390_s19, %s391_s20  }
  0x1a   :  { %376 = dma.done.wait [#allocation3], 512  }
  0x1b   :  { %377 = vsyncadd [#allocation3], 4294966784 }
  0x1c   :  { %378 = dma.done.wait [#allocation6], 1024  }
  0x1d   :  { %379 = vsyncadd [#allocation6], 4294966272  ;;  %s417_s0 = smov 0  }
  0x1e LB: > { %v60_v0 = vlaneseq  ;;  %s291_s23 = sshll.u32 %s384_s0, 4  ;;  %v56_v2 = vld [vmem:[#allocation5] sm:$0xf]  ;;  %v427_v4 = vld [vmem:[#allocation5 + $0x4] sm:$0xf]  ;;  %s294_s24 = sshll.u32 %s384_s0, 3  ;;  %s384_s0 = sphi %s417_s0, %s45_s0  }
  0x1f   : > { %v425_v3 = vld [vmem:[#allocation5 + $0x20] sm:$0xf]  ;;  %s48_s1 = scalar_lea.vmem [#allocation2], %s291_s23  ;;  %v82_v11 = vld [vmem:[#allocation5 + $0x24] sm:$0xf]  ;;  %s238_s25 = scalar_lea.vmem [#allocation7], %s294_s24 }
  0x20   : > { %v423_v1 = vshrl.u32 %v60_v0, 7  ;;  %v49_v5 = vld [vmem:[%s48_s1] sm:$0xff]  ;;  %v293_v6 = vld [vmem:[%s48_s1 + $0x8] sm:$0xff]  ;;  %v148_v34 = vld [vmem:[#allocation5 + $0x10] sm:$0xf]  ;;  %s45_s0 = sadd.s32 1, %s384_s0  }
  0x21   : > { %v433_v12 = vld [vmem:[#allocation5 + $0x8] sm:$0xf]  ;;  %v125_v20 = vld [vmem:[#allocation5 + $0xc] sm:$0xf]  ;;  %v151_v35 = vld [vmem:[#allocation5 + $0x30] sm:$0xf] }
  0x22   : > { %v62_v7 = vsub.s32 0, %v423_v1  ;;  %v85_v8 = vsub.s32 1, %v423_v1  ;;  %v108_v9 = vsub.s32 2, %v423_v1  ;;  %v131_v10 = vsub.s32 3, %v423_v1  ;;  %v105_v19 = vld [vmem:[#allocation5 + $0x28] sm:$0xf] }
  0x23   : > { %v154_v13 = vsub.s32 4, %v423_v1  ;;  %v177_v14 = vsub.s32 5, %v423_v1  ;;  %v128_v21 = vld [vmem:[#allocation5 + $0x2c] sm:$0xf]  ;;  %v171_v40 = vld [vmem:[#allocation5 + $0x14] sm:$0xf] }
  0x24   : > { %v63_v15 = vrot.slane %v49_v5, %v62_v7  ;;  %v68_v16 = vrot.slane %v293_v6, %v62_v7  ;;  %v86_v17 = vrot.slane %v49_v5, %v85_v8  ;;  %v91_v18 = vrot.slane %v293_v6, %v85_v8  ;;  %v174_v41 = vld [vmem:[#allocation5 + $0x34] sm:$0xf]  ;;  %v194_v52 = vld [vmem:[#allocation5 + $0x18] sm:$0xf]  ;;  %v217_v60 = vld [vmem:[#allocation5 + $0x1c] sm:$0xf] }
  0x25   : > { %v109_v22 = vrot.slane %v49_v5, %v108_v9  ;;  %v114_v23 = vrot.slane %v293_v6, %v108_v9  ;;  %v132_v24 = vrot.slane %v49_v5, %v131_v10  ;;  %v137_v25 = vrot.slane %v293_v6, %v131_v10  ;;  %v197_v53 = vld [vmem:[#allocation5 + $0x38] sm:$0xf]  ;;  %v220_v61 = vld [vmem:[#allocation5 + $0x3c] sm:$0xf]  ;;  %p42_p10 = scmp.ge.s32.totalorder %s45_s0, 2  }
  0x26   : > { %v64_v26 = vmul.f32 %v63_v15, %v56_v2  ;;  %v69_v27 = vmul.f32 %v68_v16, %v425_v3  ;;  %v87_v28 = vmul.f32 %v86_v17, %v427_v4  ;;  %v92_v29 = vmul.f32 %v91_v18, %v82_v11  ;;  %s392_s26 = smov (%p42_p10), [#allocation7]  }
  0x27   : > { %v110_v30 = vmul.f32 %v109_v22, %v433_v12  ;;  %v115_v31 = vmul.f32 %v114_v23, %v105_v19  ;;  %v133_v32 = vmul.f32 %v132_v24, %v125_v20  ;;  %v138_v33 = vmul.f32 %v137_v25, %v128_v21  ;;  %s248_s27 = sshll.u32 (%p42_p10), %s392_s26, 4  ;;  %s249_s27 = int_to_ptr.vmem [resolvable:$true] %s248_s27 }
  0x28   : > { %v70_v36 = vsub.f32 %v64_v26, %v69_v27  ;;  %v93_v37 = vsub.f32 %v87_v28, %v92_v29  ;;  %v155_v38 = vrot.slane %v49_v5, %v154_v13  ;;  %v160_v39 = vrot.slane %v293_v6, %v154_v13  ;;  %s352_s28 = scalar_lea.vmem (%p42_p10), %s249_s27, 256  ;;  %p357_p12 = scmp.lt.s32.totalorder (%p42_p10), %s249_s27, %s249_s27 }
  0x29   : > { %v116_v42 = vsub.f32 %v110_v30, %v115_v31  ;;  %v139_v43 = vsub.f32 %v133_v32, %v138_v33  ;;  %v178_v44 = vrot.slane %v49_v5, %v177_v14  ;;  %v183_v45 = vrot.slane %v293_v6, %v177_v14  ;;  %p353_p11 = scmp.ne.s32.totalorder (%p42_p10), %s249_s27, %s352_s28  ;;  %p358_p13 = scmp.lt.s32.totalorder (%p42_p10), %s352_s28, %s352_s28 }
  0x2a   : > { %v94_v46 = vadd.f32 %v93_v37, %v70_v36  ;;  %v156_v47 = vmul.f32 %v155_v38, %v148_v34  ;;  %v161_v48 = vmul.f32 %v160_v39, %v151_v35  ;;  %v200_v49 = vsub.s32 6, %v423_v1 }
  0x2b   : > { %v179_v50 = vmul.f32 %v178_v44, %v171_v40  ;;  %v184_v51 = vmul.f32 %v183_v45, %v174_v41  ;;  %v223_v54 = vsub.s32 7, %v423_v1  ;;  %v72_v55 = vmul.f32 %v68_v16, %v56_v2  ;;  %p359_p0 = por (%p42_p10), %p358_p13, %p357_p12 }
  0x2c   : > { %v117_v56 = vadd.f32 %v116_v42, %v94_v46  ;;  %v162_v57 = vsub.f32 %v156_v47, %v161_v48  ;;  %v201_v58 = vrot.slane %v49_v5, %v200_v49  ;;  %v206_v59 = vrot.slane %v293_v6, %v200_v49 }
  0x2d   : > { %v185_v62 = vsub.f32 %v179_v50, %v184_v51  ;;  %v224_v63 = vrot.slane %v49_v5, %v223_v54  ;;  %v229_v0 = vrot.slane %v293_v6, %v223_v54  ;;  %v73_v7 = vmul.f32 %v63_v15, %v425_v3  ;;  %p360_p1 = pnand (%p42_p10), %p359_p0, %p353_p11 }
  0x2e   : > { %v140_v8 = vadd.f32 %v139_v43, %v117_v56  ;;  %v202_v9 = vmul.f32 %v201_v58, %v194_v52  ;;  %v207_v10 = vmul.f32 %v206_v59, %v197_v53  ;;  %v95_v13 = vmul.f32 %v91_v18, %v427_v4 }
  0x2f   : > { %v225_v14 = vmul.f32 %v224_v63, %v217_v60  ;;  %v230_v1 = vmul.f32 %v229_v0, %v220_v61  ;;  %v74_v2 = vadd.f32 %v73_v7, %v72_v55  ;;  %v96_v16 = vmul.f32 %v86_v17, %v82_v11 }
  0x30   : > { %v163_v26 = vadd.f32 %v162_v57, %v140_v8  ;;  %v208_v27 = vsub.f32 %v202_v9, %v207_v10  ;;  %v118_v28 = vmul.f32 %v114_v23, %v433_v12  ;;  %v119_v29 = vmul.f32 %v109_v22, %v105_v19 }
  0x31   : > { %v231_v30 = vsub.f32 %v225_v14, %v230_v1  ;;  %v97_v5 = vadd.f32 %v96_v16, %v95_v13  ;;  %v141_v6 = vmul.f32 %v137_v25, %v125_v20  ;;  %v142_v31 = vmul.f32 %v132_v24, %v128_v21 }
  0x32   : > { %v186_v3 = vadd.f32 %v185_v62, %v163_v26  ;;  %v120_v15 = vadd.f32 %v119_v29, %v118_v28  ;;  %v164_v32 = vmul.f32 %v160_v39, %v148_v34  ;;  %v165_v33 = vmul.f32 %v155_v38, %v151_v35 }
  0x33   : > { %v98_v36 = vadd.f32 %v97_v5, %v74_v2  ;;  %v143_v4 = vadd.f32 %v142_v31, %v141_v6  ;;  %v187_v18 = vmul.f32 %v183_v45, %v171_v40  ;;  %v188_v37 = vmul.f32 %v178_v44, %v174_v41 }
  0x34   : > { %v209_v42 = vadd.f32 %v208_v27, %v186_v3  ;;  %v166_v17 = vadd.f32 %v165_v33, %v164_v32  ;;  %v210_v43 = vmul.f32 %v206_v59, %v194_v52  ;;  %v211_v46 = vmul.f32 %v201_v58, %v197_v53 }
  0x35   : > { %v121_v11 = vadd.f32 %v120_v15, %v98_v36  ;;  %v189_v22 = vadd.f32 %v188_v37, %v187_v18  ;;  %v233_v23 = vmul.f32 %v229_v0, %v217_v60  ;;  %v234_v20 = vmul.f32 %v224_v63, %v220_v61 }
  0x36   : > { %v232_v12 = vadd.f32 %v231_v30, %v209_v42  ;;  %v212_v24 = vadd.f32 %v211_v46, %v210_v43 }
  0x37   : > { %v144_v19 = vadd.f32 %v143_v4, %v121_v11  ;;  %v235_v34 = vadd.f32 %v234_v20, %v233_v23 }
  0x38   : > { %239 = vst [vmem:[%s238_s25] sm:$0xf] %v232_v12 }
  0x39   : > { %v167_v21 = vadd.f32 %v166_v17, %v144_v19 }
  0x3b   : > { %v190_v25 = vadd.f32 %v189_v22, %v167_v21 }
  0x3d   : > { %v213_v35 = vadd.f32 %v212_v24, %v190_v25  ;;  %44 = sbr.rel (!%p42_p10) target bundleno = 30 (0x1e), region = 63 }
  0x3f   : > { %v236_v38 = vadd.f32 %v235_v34, %v213_v35 }
  0x41   : > { %296 = vst [vmem:[%s238_s25 + $0x4] sm:$0xf] %v236_v38 }
  0x42   :  { %363 = shalt.err (!%p360_p1)
}
  0x43   :  { %254 = dma.vmem_to_hbm [thread:$0]  %s249_s27, 256, %s457_s2, [#allocation4], %s390_s19, %s390_s19, %s391_s20  }
  0x44   :  { %380 = dma.done.wait [#allocation4], 256  }
  0x45   :  { %381 = vsyncadd [#allocation4], 4294967040 }
  0x46   :  { %258 = vsyncpa [#allocation3], 1 }
  0x47   :  { %259 = vsyncpa [#allocation6], 1 }
  0x48   :  { %260 = vsyncpa [#allocation4], 1 }

</bundles_post_ra>
